<compile_context>
chip_gen: v7x
topology: tpu7x:2x2x1
jax: 0.10.0
libtpu: 0.0.40
codegen_flags: <defaults>
</compile_context>

<pallas_src>
import functools

import jax
import jax.numpy as jnp
from jax import lax
from jax.experimental import pallas as pl
from jax.experimental.pallas import tpu as pltpu


def _cdiv(a, b):
    return -(-a // b)


def _round_up(x, m):
    return _cdiv(x, m) * m


# --------------------------------------------------------------------------- #
# Kernel                                                                       #
# --------------------------------------------------------------------------- #
def _mha_rom_kernel(q_ref, k_ref, v_ref, w_ref, b_ref, m_ref, o_ref, *,
                    S, D, flat_in, flat_out, compute_dtype, precision):
    """One grid step: `bt` batch rows of linear attention + out_proj.

    q/k/v blocks: (bt, S, D)   (or lane-dense (bt, S*D) when flat_in)
    w: (D, D) PyTorch nn.Linear layout (out, in);  b: (1, D)
    m: (D, D) f32 block-diagonal head mask (resident constant)
    o block: (bt, S, D)        (or lane-dense (1, bt, S*D) when flat_out)
    """
    def load(ref):
        x = ref[...]
        if flat_in:
            x = x.reshape(x.shape[0], S, D)
        if compute_dtype is not None:
            x = x.astype(compute_dtype)
        return x

    q, k, v = load(q_ref), load(k_ref), load(v_ref)
    bt = q.shape[0]
    w = w_ref[...]
    if compute_dtype is not None:
        w = w.astype(compute_dtype)

    # kv[b, f, e] = sum_s k[b, s, f] * v[b, s, e]  -- contract over S directly
    # (MXU consumes the transposed operand natively, no XLU transpose).
    kv = lax.dot_general(
        k, v, (((1,), (1,)), ((0,), (0,))),
        preferred_element_type=jnp.float32, precision=precision)

    # Keep only the per-head diagonal blocks (block h is exactly K_h^T @ V_h).
    # The resident 0/1 mask turns one dense DxD matmul into per-head attention.
    # TODO(synk): for D >> 128, switch to a head-tiled KV (extra head grid axis)
    # instead of the dense DxD KV + block-diagonal mask used here.
    kv = (kv * m_ref[...]).astype(q.dtype)

    # z[b] = Q_b @ KV_blockdiag[b]; column order already matches PyTorch's
    # permute(0,2,1,3).contiguous().view(B, S, D) head merge.
    z = lax.dot_general(
        q, kv, (((2,), (1,)), ((0,), (0,))),
        preferred_element_type=jnp.float32, precision=precision)

    # out_proj as one (bt*S, D) @ W^T matmul (contract against W's input axis,
    # so W is never transposed).  Bias added in f32.
    z2 = z.reshape(bt * S, D).astype(w.dtype)
    out = lax.dot_general(
        z2, w, (((1,), (1,)), ((), ())),
        preferred_element_type=jnp.float32, precision=precision)
    out = (out + b_ref[...].astype(jnp.float32)).astype(o_ref.dtype)

    if flat_out:
        # Lane-dense store: S*D (>=128) lanes per row instead of D=32 masked lanes.
        o_ref[...] = out.reshape(1, bt, S * D)
    else:
        o_ref[...] = out.reshape(bt, S, D)


# --------------------------------------------------------------------------- #
# Sizing helpers                                                               #
# --------------------------------------------------------------------------- #
@functools.lru_cache(maxsize=None)
def _vmem_caps():
    """(block-picker budget, scoped-VMEM limit) derived from this chip's VMEM."""
    cap = 64 << 20                      # conservative default (v7x per-core VMEM)
    try:
        cap = int(getattr(pltpu.get_tpu_info(), "vmem_capacity_bytes", cap))
    except Exception:                   # pragma: no cover - non-TPU / old runtime
        pass
    budget = (cap * 5) // 8             # ~40 MiB on v7x, ~80 MiB on v5e/v6e
    limit = min((cap * 3) // 4, 128 << 20)
    return int(budget), int(limit)


def _pick_batch_block(B, S, D, itemsize, vmem_budget, lane_dense):
    """Batch rows per grid step (bytes-based, generation-aware).

    Targets ~1-4 MiB of HBM per Q/K/V/out block so the ~0.35us per-grid-step
    overhead is amortised against DMA time, while double-buffered blocks plus
    the f32 kv/z intermediates (with (8,128) lane padding) fit the VMEM budget.
    """
    lanes = lambda n: _round_up(n, 128)

    io_row = 4 * (lanes(S * D) if lane_dense else S * lanes(D)) * itemsize
    io_row *= 2                                         # Pallas double-buffers I/O
    inter_row = (D * lanes(D) + 2 * S * lanes(D)) * 4   # kv + z + f32 out intermediates
    row_vmem = io_row + inter_row

    bt = max(1, vmem_budget // row_vmem)                      # VMEM-limited
    bt = min(bt, max(1, (4 << 20) // (S * D * itemsize)))     # <= ~4 MiB per block
    bt = min(bt, max(1, _cdiv(B, 2)))                         # >= 2 steps (v7x megacore)

    # Alignment: Bt multiple of 8 (dense sublanes / legal 2-D blocks), with
    # Bt*S ~ a multiple of 256 rows so the out_proj tiles the MXU cleanly.
    align = 8 * max(1, _cdiv(32, S))
    if bt >= align:
        bt -= bt % align
    elif bt >= 8:
        bt -= bt % 8
    return max(1, bt)


# --------------------------------------------------------------------------- #
# Wrapper                                                                      #
# --------------------------------------------------------------------------- #
def _forward(Q, K, V, W, b2, mask, *, compute_dtype, precision, lane_dense):
    B, S, D = Q.shape
    itemsize = jnp.dtype(Q.dtype).itemsize
    budget, vmem_limit = _vmem_caps()
    bt = _pick_batch_block(B, S, D, itemsize, budget, lane_dense)
    G = _cdiv(B, bt)

    # Lane-dense input blocks are only legal when the (bt, S*D) block obeys the
    # (8,128)-tiling rule (bt % 8 == 0 or bt == B); tiny batches keep the
    # natural (bt, S, D) layout (last two block dims == full dims, always legal).
    flat_in = lane_dense and (bt % 8 == 0 or bt == B)
    flat_out = lane_dense

    if flat_in:
        qkv = tuple(x.reshape(B, S * D) for x in (Q, K, V))   # free metadata reshape
        qkv_spec = pl.BlockSpec((bt, S * D), lambda i: (i, 0))
    else:
        qkv = (Q, K, V)
        qkv_spec = pl.BlockSpec((bt, S, D), lambda i: (i, 0, 0))

    if flat_out:
        # Padded (G, bt, S*D) output: always satisfies the block-tiling rule,
        # gives unmasked 128+-lane stores, and avoids OOB writes when bt !| B.
        out_shape = jax.ShapeDtypeStruct((G, bt, S * D), Q.dtype)
        out_spec = pl.BlockSpec((1, bt, S * D), lambda i: (i, 0, 0))
    else:
        out_shape = jax.ShapeDtypeStruct((G * bt, S, D), Q.dtype)
        out_spec = pl.BlockSpec((bt, S, D), lambda i: (i, 0, 0))

    kernel = functools.partial(
        _mha_rom_kernel, S=S, D=D, flat_in=flat_in, flat_out=flat_out,
        compute_dtype=compute_dtype, precision=precision)

    cost = pl.CostEstimate(
        flops=int(6 * B * S * D * D),                  # KV + z + out_proj
        transcendentals=0,
        bytes_accessed=int(itemsize * 4 * B * S * D + 4 * (2 * D * D + 2 * D)),
    )

    out = pl.pallas_call(
        kernel,
        out_shape=out_shape,
        grid_spec=pltpu.PrefetchScalarGridSpec(
            num_scalar_prefetch=0,
            grid=(G,),
            in_specs=[qkv_spec, qkv_spec, qkv_spec,
                      pl.BlockSpec((D, D), lambda i: (0, 0)),     # W (out, in)
                      pl.BlockSpec((1, D), lambda i: (0, 0)),     # bias
                      pl.BlockSpec((D, D), lambda i: (0, 0))],    # head mask
            out_specs=out_spec),
        compiler_params=pltpu.CompilerParams(
            dimension_semantics=("parallel",),
            vmem_limit_bytes=int(vmem_limit)),
        cost_estimate=cost,
    )(*qkv, W, b2, mask)

    out = out.reshape(G * bt, S, D)
    if G * bt != B:
        out = out[:B]
    return out


def multi_head_attention_rom(Q, K, V, W, b, num_heads,
                             compute_dtype=None, precision=None,
                             lane_dense_out=None):
    """Pallas-TPU forward of MultiHeadAttentionROM.

    Q, K, V: (B, S, D) in f32 or bf16 -- the kernel is HBM-bound, so bf16 *I/O*
    (not just a bf16 compute_dtype) is the real ~2x lever.
    W: (D, D) PyTorch nn.Linear weight (out, in); b: (D,).
    precision: optional lax.Precision for the MXU (HIGHEST = exact f32 passes).
    compute_dtype: optional matmul operand dtype (f32 accumulation); does NOT
        reduce HBM traffic.
    lane_dense_out: force/disable the lane-dense (S*D-wide) I/O layout; None =
        try it and fall back if this Mosaic build can't lower the in-kernel
        sublane->lane reshape.
    Returns (B, S, D) in Q.dtype.
    """
    B, S, D = Q.shape
    assert D % num_heads == 0, "d_model must be divisible by num_heads"

    b2 = b.reshape(1, D)
    head = jnp.arange(D, dtype=jnp.int32) // (D // num_heads)
    mask = (head[:, None] == head[None, :]).astype(jnp.float32)

    run = functools.partial(_forward, Q, K, V, W, b2, mask,
                            compute_dtype=compute_dtype, precision=precision)
    if lane_dense_out is None:
        try:
            return jax.block_until_ready(run(lane_dense=True))
        except Exception:
            return run(lane_dense=False)
    return run(lane_dense=bool(lane_dense_out))


# --------------------------------------------------------------------------- #
# Reference & self-test                                                        #
# --------------------------------------------------------------------------- #
def _reference(Q, K, V, W, b, num_heads, precision=None):
    B, S, D = Q.shape
    Dh = D // num_heads

    def split(x):
        return jnp.transpose(x.reshape(B, S, num_heads, Dh), (0, 2, 1, 3))

    Qh, Kh, Vh = split(Q), split(K), split(V)
    KV = jnp.einsum("bhsd,bhse->bhde", Kh, Vh, precision=precision)
    z = jnp.einsum("bhsd,bhde->bhse", Qh, KV, precision=precision)
    z = jnp.transpose(z, (0, 2, 1, 3)).reshape(B, S, D)
    return jnp.einsum("bsd,ed->bse", z, W, precision=precision) + b


if __name__ == "__main__":
    # shapes consistent with the module: batch=2, basis_dim=8 (seq), d_model=32, 4 heads
    B, S, D, H = 2, 8, 32, 4

    key = jax.random.PRNGKey(0)
    kq, kk, kv_, kw, kb = jax.random.split(key, 5)
    Q = jax.random.normal(kq, (B, S, D), dtype=jnp.float32)
    K = jax.random.normal(kk, (B, S, D), dtype=jnp.float32)
    V = jax.random.normal(kv_, (B, S, D), dtype=jnp.float32)

    # nn.Linear(d_model, d_model) parameters
    bound = 1.0 / jnp.sqrt(jnp.float32(D))
    W = jax.random.uniform(kw, (D, D), minval=-bound, maxval=bound, dtype=jnp.float32)
    bias = jax.random.uniform(kb, (D,), minval=-bound, maxval=bound, dtype=jnp.float32)

    hi = lax.Precision.HIGHEST

    # 1) exact-f32 path (HIGHEST precision on both kernel and reference).
    ref = _reference(Q, K, V, W, bias, H, precision=hi)
    out = jax.block_until_ready(
        multi_head_attention_rom(Q, K, V, W, bias, H, precision=hi))
    assert out.shape == (B, S, D)
    assert jnp.allclose(out, ref, atol=1e-4, rtol=1e-4), \
        float(jnp.max(jnp.abs(out - ref)))

    # 2) bf16 I/O path (halves HBM traffic -- the real ~2x in this mem-bound
    #    regime).  Tolerance scaled to bf16 resolution x contraction depth.
    Qb, Kb, Vb = (x.astype(jnp.bfloat16) for x in (Q, K, V))
    ref_b = _reference(Qb.astype(jnp.float32), Kb.astype(jnp.float32),
                       Vb.astype(jnp.float32), W, bias, H, precision=hi)
    out_b = jax.block_until_ready(
        multi_head_attention_rom(Qb, Kb, Vb, W, bias, H))
    assert out_b.shape == (B, S, D)
    assert jnp.allclose(out_b.astype(jnp.float32), ref_b, atol=0.2, rtol=0.05), \
        float(jnp.max(jnp.abs(out_b.astype(jnp.float32) - ref_b)))

    # 3) non-divisible batch exercises the cdiv grid / padded-output path.
    B3 = 3
    Q3 = jax.random.normal(jax.random.PRNGKey(1), (B3, S, D), dtype=jnp.float32)
    ref3 = _reference(Q3, Q3, Q3, W, bias, H, precision=hi)
    out3 = jax.block_until_ready(
        multi_head_attention_rom(Q3, Q3, Q3, W, bias, H, precision=hi))
    assert out3.shape == (B3, S, D)
    assert jnp.allclose(out3, ref3, atol=1e-4, rtol=1e-4), \
        float(jnp.max(jnp.abs(out3 - ref3)))

    print("KERNEL_OK")
</pallas_src>

<mosaic_0001>
module attributes {stable_mosaic.version = 11 : i64} {
  func.func @_mha_rom_kernel(%arg0: i32, %arg1: memref<1x8x32xf32, #tpu.memory_space<vmem>>, %arg2: memref<1x8x32xf32, #tpu.memory_space<vmem>>, %arg3: memref<1x8x32xf32, #tpu.memory_space<vmem>>, %arg4: memref<32x32xf32, #tpu.memory_space<vmem>>, %arg5: memref<1x32xf32, #tpu.memory_space<vmem>>, %arg6: memref<32x32xf32, #tpu.memory_space<vmem>>, %arg7: memref<1x1x256xf32, #tpu.memory_space<vmem>>) attributes {dimension_semantics = [#tpu.dimension_semantics<parallel>], iteration_bounds = array<i64: 2>, scalar_prefetch = 0 : i64, scratch_operands = 0 : i64, tpu.core_type = #tpu.core_type<tc>, window_params = [{transform_indices = @transform_0, window_bounds = array<i64: 1, 8, 32>}, {transform_indices = @transform_1, window_bounds = array<i64: 1, 8, 32>}, {transform_indices = @transform_2, window_bounds = array<i64: 1, 8, 32>}, {pipeline_mode = #tpu.pipeline_mode<synchronous>, transform_indices = @transform_3, window_bounds = array<i64: 32, 32>}, {pipeline_mode = #tpu.pipeline_mode<synchronous>, transform_indices = @transform_4, window_bounds = array<i64: 1, 32>}, {pipeline_mode = #tpu.pipeline_mode<synchronous>, transform_indices = @transform_5, window_bounds = array<i64: 32, 32>}, {transform_indices = @transform_6, window_bounds = array<i64: 1, 1, 256>}]} {
    %c0 = arith.constant 0 : index
    %c0_0 = arith.constant 0 : index
    %c0_1 = arith.constant 0 : index
    %0 = vector.load %arg1[%c0, %c0_0, %c0_1] : memref<1x8x32xf32, #tpu.memory_space<vmem>>, vector<1x8x32xf32>
    %c0_2 = arith.constant 0 : index
    %c0_3 = arith.constant 0 : index
    %c0_4 = arith.constant 0 : index
    %1 = vector.load %arg2[%c0_2, %c0_3, %c0_4] : memref<1x8x32xf32, #tpu.memory_space<vmem>>, vector<1x8x32xf32>
    %c0_5 = arith.constant 0 : index
    %c0_6 = arith.constant 0 : index
    %c0_7 = arith.constant 0 : index
    %2 = vector.load %arg3[%c0_5, %c0_6, %c0_7] : memref<1x8x32xf32, #tpu.memory_space<vmem>>, vector<1x8x32xf32>
    %c0_8 = arith.constant 0 : index
    %c0_9 = arith.constant 0 : index
    %3 = vector.load %arg4[%c0_8, %c0_9] : memref<32x32xf32, #tpu.memory_space<vmem>>, vector<32x32xf32>
    %cst = arith.constant dense<0.000000e+00> : vector<1x32x32xf32>
    %4 = tpu.matmul %1, %2, %cst {dimension_numbers = #tpu.dot_dimension_numbers<[1], [1], [2], [2], [0, 0, 0, 2, 1, 2], [0], [0]>, precision = #tpu.contract_precision<fp32>} : vector<1x8x32xf32>, vector<1x8x32xf32>, vector<1x32x32xf32> -> vector<1x32x32xf32>
    %c0_10 = arith.constant 0 : index
    %c0_11 = arith.constant 0 : index
    %5 = vector.load %arg6[%c0_10, %c0_11] : memref<32x32xf32, #tpu.memory_space<vmem>>, vector<32x32xf32>
    %6 = vector.shape_cast %5 : vector<32x32xf32> to vector<1x32x32xf32>
    %7 = arith.mulf %4, %6 : vector<1x32x32xf32>
    %cst_12 = arith.constant dense<0.000000e+00> : vector<1x8x32xf32>
    %8 = tpu.matmul %0, %7, %cst_12 {dimension_numbers = #tpu.dot_dimension_numbers<[2], [1], [1], [2], [0, 0, 0, 1, 1, 2], [0], [0]>, precision = #tpu.contract_precision<fp32>} : vector<1x8x32xf32>, vector<1x32x32xf32>, vector<1x8x32xf32> -> vector<1x8x32xf32>
    %9 = vector.shape_cast %8 : vector<1x8x32xf32> to vector<8x32xf32>
    %cst_13 = arith.constant dense<0.000000e+00> : vector<8x32xf32>
    %10 = tpu.matmul %9, %3, %cst_13 {dimension_numbers = #tpu.dot_dimension_numbers<[1], [1], [0], [0], [0, 0, 1, 0], [], []>, precision = #tpu.contract_precision<fp32>} : vector<8x32xf32>, vector<32x32xf32>, vector<8x32xf32> -> vector<8x32xf32>
    %c0_14 = arith.constant 0 : index
    %c0_15 = arith.constant 0 : index
    %11 = vector.load %arg5[%c0_14, %c0_15] : memref<1x32xf32, #tpu.memory_space<vmem>>, vector<1x32xf32>
    %12 = vector.broadcast %11 : vector<1x32xf32> to vector<8x32xf32>
    %13 = arith.addf %10, %12 : vector<8x32xf32>
    %14 = vector.shape_cast %13 : vector<8x32xf32> to vector<1x1x256xf32>
    %c0_16 = arith.constant 0 : index
    %c0_17 = arith.constant 0 : index
    %c0_18 = arith.constant 0 : index
    %15 = vector.load %arg7[%c0_16, %c0_17, %c0_18] : memref<1x1x256xf32, #tpu.memory_space<vmem>>, vector<1x1x256xf32>
    tpu.vector_store %arg7[%c0_16, %c0_17, %c0_18], %14 {strides = array<i32>} : memref<1x1x256xf32, #tpu.memory_space<vmem>>, vector<1x1x256xf32>,
    return
  }
  func.func @transform_0(%arg0: i32) -> (i32, i32, i32) {
    %c0_i32 = arith.constant 0 : i32
    %c0_i32_0 = arith.constant 0 : i32
    %c0_i32_1 = arith.constant 0 : i32
    return %arg0, %c0_i32, %c0_i32_0 : i32, i32, i32
  }
  func.func @transform_1(%arg0: i32) -> (i32, i32, i32) {
    %c0_i32 = arith.constant 0 : i32
    %c0_i32_0 = arith.constant 0 : i32
    %c0_i32_1 = arith.constant 0 : i32
    return %arg0, %c0_i32, %c0_i32_0 : i32, i32, i32
  }
  func.func @transform_2(%arg0: i32) -> (i32, i32, i32) {
    %c0_i32 = arith.constant 0 : i32
    %c0_i32_0 = arith.constant 0 : i32
    %c0_i32_1 = arith.constant 0 : i32
    return %arg0, %c0_i32, %c0_i32_0 : i32, i32, i32
  }
  func.func @transform_3(%arg0: i32) -> (i32, i32) {
    %c0_i32 = arith.constant 0 : i32
    %c0_i32_0 = arith.constant 0 : i32
    %c0_i32_1 = arith.constant 0 : i32
    return %c0_i32, %c0_i32_0 : i32, i32
  }
  func.func @transform_4(%arg0: i32) -> (i32, i32) {
    %c0_i32 = arith.constant 0 : i32
    %c0_i32_0 = arith.constant 0 : i32
    %c0_i32_1 = arith.constant 0 : i32
    return %c0_i32, %c0_i32_0 : i32, i32
  }
  func.func @transform_5(%arg0: i32) -> (i32, i32) {
    %c0_i32 = arith.constant 0 : i32
    %c0_i32_0 = arith.constant 0 : i32
    %c0_i32_1 = arith.constant 0 : i32
    return %c0_i32, %c0_i32_0 : i32, i32
  }
  func.func @transform_6(%arg0: i32) -> (i32, i32, i32) {
    %c0_i32 = arith.constant 0 : i32
    %c0_i32_0 = arith.constant 0 : i32
    %c0_i32_1 = arith.constant 0 : i32
    return %arg0, %c0_i32, %c0_i32_0 : i32, i32, i32
  }
}

module attributes {stable_mosaic.version = 11 : i64} {
  func.func @_mha_rom_kernel(%arg0: i32, %arg1: memref<1x8x32xf32, #tpu.memory_space<vmem>>, %arg2: memref<1x8x32xf32, #tpu.memory_space<vmem>>, %arg3: memref<1x8x32xf32, #tpu.memory_space<vmem>>, %arg4: memref<32x32xf32, #tpu.memory_space<vmem>>, %arg5: memref<1x32xf32, #tpu.memory_space<vmem>>, %arg6: memref<32x32xf32, #tpu.memory_space<vmem>>, %arg7: memref<1x8x32xf32, #tpu.memory_space<vmem>>) attributes {dimension_semantics = [#tpu.dimension_semantics<parallel>], iteration_bounds = array<i64: 2>, scalar_prefetch = 0 : i64, scratch_operands = 0 : i64, tpu.core_type = #tpu.core_type<tc>, window_params = [{transform_indices = @transform_0, window_bounds = array<i64: 1, 8, 32>}, {transform_indices = @transform_1, window_bounds = array<i64: 1, 8, 32>}, {transform_indices = @transform_2, window_bounds = array<i64: 1, 8, 32>}, {pipeline_mode = #tpu.pipeline_mode<synchronous>, transform_indices = @transform_3, window_bounds = array<i64: 32, 32>}, {pipeline_mode = #tpu.pipeline_mode<synchronous>, transform_indices = @transform_4, window_bounds = array<i64: 1, 32>}, {pipeline_mode = #tpu.pipeline_mode<synchronous>, transform_indices = @transform_5, window_bounds = array<i64: 32, 32>}, {transform_indices = @transform_6, window_bounds = array<i64: 1, 8, 32>}]} {
    %c0 = arith.constant 0 : index
    %c0_0 = arith.constant 0 : index
    %c0_1 = arith.constant 0 : index
    %0 = vector.load %arg1[%c0, %c0_0, %c0_1] : memref<1x8x32xf32, #tpu.memory_space<vmem>>, vector<1x8x32xf32>
    %c0_2 = arith.constant 0 : index
    %c0_3 = arith.constant 0 : index
    %c0_4 = arith.constant 0 : index
    %1 = vector.load %arg2[%c0_2, %c0_3, %c0_4] : memref<1x8x32xf32, #tpu.memory_space<vmem>>, vector<1x8x32xf32>
    %c0_5 = arith.constant 0 : index
    %c0_6 = arith.constant 0 : index
    %c0_7 = arith.constant 0 : index
    %2 = vector.load %arg3[%c0_5, %c0_6, %c0_7] : memref<1x8x32xf32, #tpu.memory_space<vmem>>, vector<1x8x32xf32>
    %c0_8 = arith.constant 0 : index
    %c0_9 = arith.constant 0 : index
    %3 = vector.load %arg4[%c0_8, %c0_9] : memref<32x32xf32, #tpu.memory_space<vmem>>, vector<32x32xf32>
    %cst = arith.constant dense<0.000000e+00> : vector<1x32x32xf32>
    %4 = tpu.matmul %1, %2, %cst {dimension_numbers = #tpu.dot_dimension_numbers<[1], [1], [2], [2], [0, 0, 0, 2, 1, 2], [0], [0]>, precision = #tpu.contract_precision<fp32>} : vector<1x8x32xf32>, vector<1x8x32xf32>, vector<1x32x32xf32> -> vector<1x32x32xf32>
    %c0_10 = arith.constant 0 : index
    %c0_11 = arith.constant 0 : index
    %5 = vector.load %arg6[%c0_10, %c0_11] : memref<32x32xf32, #tpu.memory_space<vmem>>, vector<32x32xf32>
    %6 = vector.shape_cast %5 : vector<32x32xf32> to vector<1x32x32xf32>
    %7 = arith.mulf %4, %6 : vector<1x32x32xf32>
    %cst_12 = arith.constant dense<0.000000e+00> : vector<1x8x32xf32>
    %8 = tpu.matmul %0, %7, %cst_12 {dimension_numbers = #tpu.dot_dimension_numbers<[2], [1], [1], [2], [0, 0, 0, 1, 1, 2], [0], [0]>, precision = #tpu.contract_precision<fp32>} : vector<1x8x32xf32>, vector<1x32x32xf32>, vector<1x8x32xf32> -> vector<1x8x32xf32>
    %9 = vector.shape_cast %8 : vector<1x8x32xf32> to vector<8x32xf32>
    %cst_13 = arith.constant dense<0.000000e+00> : vector<8x32xf32>
    %10 = tpu.matmul %9, %3, %cst_13 {dimension_numbers = #tpu.dot_dimension_numbers<[1], [1], [0], [0], [0, 0, 1, 0], [], []>, precision = #tpu.contract_precision<fp32>} : vector<8x32xf32>, vector<32x32xf32>, vector<8x32xf32> -> vector<8x32xf32>
    %c0_14 = arith.constant 0 : index
    %c0_15 = arith.constant 0 : index
    %11 = vector.load %arg5[%c0_14, %c0_15] : memref<1x32xf32, #tpu.memory_space<vmem>>, vector<1x32xf32>
    %12 = vector.broadcast %11 : vector<1x32xf32> to vector<8x32xf32>
    %13 = arith.addf %10, %12 : vector<8x32xf32>
    %14 = vector.shape_cast %13 : vector<8x32xf32> to vector<1x8x32xf32>
    %c0_16 = arith.constant 0 : index
    %c0_17 = arith.constant 0 : index
    %c0_18 = arith.constant 0 : index
    %15 = vector.load %arg7[%c0_16, %c0_17, %c0_18] : memref<1x8x32xf32, #tpu.memory_space<vmem>>, vector<1x8x32xf32>
    tpu.vector_store %arg7[%c0_16, %c0_17, %c0_18], %14 {strides = array<i32>} : memref<1x8x32xf32, #tpu.memory_space<vmem>>, vector<1x8x32xf32>,
    return
  }
  func.func @transform_0(%arg0: i32) -> (i32, i32, i32) {
    %c0_i32 = arith.constant 0 : i32
    %c0_i32_0 = arith.constant 0 : i32
    %c0_i32_1 = arith.constant 0 : i32
    return %arg0, %c0_i32, %c0_i32_0 : i32, i32, i32
  }
  func.func @transform_1(%arg0: i32) -> (i32, i32, i32) {
    %c0_i32 = arith.constant 0 : i32
    %c0_i32_0 = arith.constant 0 : i32
    %c0_i32_1 = arith.constant 0 : i32
    return %arg0, %c0_i32, %c0_i32_0 : i32, i32, i32
  }
  func.func @transform_2(%arg0: i32) -> (i32, i32, i32) {
    %c0_i32 = arith.constant 0 : i32
    %c0_i32_0 = arith.constant 0 : i32
    %c0_i32_1 = arith.constant 0 : i32
    return %arg0, %c0_i32, %c0_i32_0 : i32, i32, i32
  }
  func.func @transform_3(%arg0: i32) -> (i32, i32) {
    %c0_i32 = arith.constant 0 : i32
    %c0_i32_0 = arith.constant 0 : i32
    %c0_i32_1 = arith.constant 0 : i32
    return %c0_i32, %c0_i32_0 : i32, i32
  }
  func.func @transform_4(%arg0: i32) -> (i32, i32) {
    %c0_i32 = arith.constant 0 : i32
    %c0_i32_0 = arith.constant 0 : i32
    %c0_i32_1 = arith.constant 0 : i32
    return %c0_i32, %c0_i32_0 : i32, i32
  }
  func.func @transform_5(%arg0: i32) -> (i32, i32) {
    %c0_i32 = arith.constant 0 : i32
    %c0_i32_0 = arith.constant 0 : i32
    %c0_i32_1 = arith.constant 0 : i32
    return %c0_i32, %c0_i32_0 : i32, i32
  }
  func.func @transform_6(%arg0: i32) -> (i32, i32, i32) {
    %c0_i32 = arith.constant 0 : i32
    %c0_i32_0 = arith.constant 0 : i32
    %c0_i32_1 = arith.constant 0 : i32
    return %arg0, %c0_i32, %c0_i32_0 : i32, i32, i32
  }
}

</mosaic_0001>

<bundles_post_ra>
// kernel: tpu_custom_call.1
= control target key start
LH: loop header
LB: loop body
LE: loop exit
PB: predicated region body
PF: predicated region fallthrough
CT: control target
= control target key end

     0   :  { %s3303_s0 = inlined_call_operand.hbm [shape: f32[2,8,32], index: 0, kind: input, shape index: {}]   ;;  %s3304_s1 = inlined_call_operand.hbm [shape: f32[2,8,32], index: 1, kind: input, shape index: {}]   ;;  %s3305_s2 = inlined_call_operand.hbm [shape: f32[2,8,32], index: 2, kind: input, shape index: {}]   ;;  %s3306_s3 = inlined_call_operand.hbm [shape: f32[32,32], index: 3, kind: input, shape index: {}]   ;;  %s3307_s4 = inlined_call_operand.vmem [shape: f32[1,32], index: 4, kind: input, shape index: {}]   ;;  %s3308_s5 = inlined_call_operand.hbm [shape: f32[32,32], index: 5, kind: input, shape index: {}]   ;;  %s3309_s6 = inlined_call_operand.hbm [shape: f32[2,8,32], index: 6, kind: output, shape index: {}]  }
   0x1   :  { %3326 = sst [smem:[#allocation18_spill]] %s3304_s1 }
   0x2   :  { %3327 = sst [smem:[#allocation19_spill]] %s3306_s3 }
   0x3   :  { %11 = vsyncpa [#allocation3], 0 }
   0x4   :  { %13 = vsyncpa [#allocation3 + $0x1], 0 }
   0x5   :  { %14 = vsyncpa [#allocation6], 0 }
   0x6   :  { %16 = vsyncpa [#allocation6 + $0x1], 0 }
   0x7   :  { %17 = vsyncpa [#allocation9], 0 }
   0x8   :  { %18 = vsyncpa [#allocation4], 0 }
   0x9   :  { %20 = vsyncpa [#allocation4 + $0x1], 0  ;;  %s2900_s21 = smov 0   ;;  %s2902_s22 = smov 0  }
   0xa   :  { %s2904_s23 = smov 0   ;;  %s2906_s24 = smov 0  }
   0xb LB: > { %s2921_s25 = sadd.s32 4294967295, %s2852_s24   ;;  %s2145_s26 = sadd.s32 4294967294, %s2852_s24   ;;  %s2852_s24 = sphi %s2906_s24, %s3356_s24   ;;  %s2848_s23 = sphi %s2904_s23, %s3360_s23   ;;  %s2844_s22 = sphi %s2902_s22, %s3359_s22   ;;  %s2840_s21 = sphi %s2900_s21, %s3358_s21  }
   0xc   : > { %p46_p0 = scmp.ne.s32.totalorder %s2844_s22, %s2840_s21  ;;  %p3310_p1 = scmp.eq.s32.totalorder %s2921_s25, 0 }
   0xd   : > { %p191_p3 = scmp.eq.s32.totalorder %s2145_s26, 1  ;;  %p2146_p5 = scmp.ge.s32.totalorder %s2852_s24, 1 }
   0xe   : > { %p2930_p4 = por %p3310_p1, %p46_p0  ;;  %p198_p7 = scmp.lt.s32.totalorder %s2852_s24, 3 }
   0xf   : > { %p2935_p6 = por %p191_p3, %p46_p0  ;;  %s2854_s30 = smov [#allocation8]  }
  0x10   : > { %s3328_s27 = scalar_select %p2930_p4, 1, 0 }
  0x11   : > { %s3329_s28 = scalar_select %p2935_p6, 1, 0 }
  0x12   : > { %p2940_p8 = pnand %p2146_p5, %p198_p7  ;;  %s210_s7 = sshll.u32 %s2854_s30, 4  ;;  %s2944_s7 = int_to_ptr.vmem [resolvable:$true] %s210_s7 }
  0x13   : > { %s2956_s9 = sadd.s32 1, %s2852_s24   ;;  %s33_s10 = sadd.s32 1, %s2848_s23 }
  0x14   : > { %s3330_s29 = scalar_select %p2940_p8, 1, 0 }
  0x15   : > { %p2566_p9 = pneg %p2940_p8  ;;  %3332 = sst [smem:[#allocation16_spill]] %s2956_s9 }
  0x16   : > { %s30_s11 = ssub.s32 %s2852_s24, %s2956_s9  ;;  %s3333_s3 = sld [smem:[#allocation19_spill]] }
  0x17   : > { %p2951_p11 = pnand %p2566_p9, %p3310_p1 }
  0x19   : > { %s3331_s8 = scalar_select %p2951_p11, 1, 0 }
  0x1a   : > { %p3314_p13 = pneg %p2951_p11 }
  0x1c   : > { %s2632_s14 = scalar_lea.hbm %s3333_s3, 512 }
  0x1d   : > { %p2633_p12 = scmp.ne.s32.totalorder %s3333_s3, %s2632_s14  ;;  %p2639_p5 = scmp.lt.u32.totalorder %s2632_s14, %s3333_s3 }
  0x1f   : > { %p2635_p0 = pnand %p3314_p13, %p2633_p12 }
  0x21   : > { %p2636_p3 = pneg %p2635_p0 }
  0x23   : > { %p2641_p7 = pnand %p2639_p5, %p2636_p3 }
  0x25   : > { %2644 = shalt.err (!%p2641_p7)
}
  0x26   : > { %s2645_s19 = scalar_lea.vmem %s2944_s7, 512  ;;  %p2653_p2 = scmp.lt.s32.totalorder %s2944_s7, %s2944_s7 }
  0x27   : > { %p2646_p9 = scmp.ne.s32.totalorder %s2944_s7, %s2645_s19  ;;  %p2654_p12 = scmp.lt.s32.totalorder %s2645_s19, %s2645_s19 }
  0x29   : > { %p2648_p10 = pnand %p2646_p9, %p3314_p13  ;;  %p2655_p0 = por %p2654_p12, %p2653_p2 }
  0x2b   : > { %p2649_p1 = pneg %p2648_p10 }
  0x2d   : > { %p2656_p6 = pnand %p2655_p0, %p2649_p1 }
  0x2f   : > { %2659 = shalt.err (!%p2656_p6)
}
  0x30   : > { %s3312_s20 = smov 128   ;;  %s3313_s26 = smov 8  }
  0x31   : > { %2569 = dma.hbm_to_vmem [thread:$0]  (!%p2951_p11), %s3333_s3, 512, %s2944_s7, [#allocation9], %s3312_s20, %s3312_s20, %s3313_s26  }
  0x32   : > { %p31_p1 = scmp.eq.s32.totalorder %s30_s11, 0  ;;  %p40_p2 = scmp.ne.s32.totalorder %s2848_s23, %s2844_s22 }
  0x33   : > { %p41_p6 = scmp.eq.s32.totalorder %s2852_s24, 0  ;;  %p2589_p10 = scmp.lt.s32.totalorder %s2852_s24, 2 }
  0x34   : > { %s2996_s13 = scalar_select %p31_p1, %s2848_s23, %s33_s10  }
  0x35   : > { %p42_p3 = por %p41_p6, %p40_p2  ;;  %p3335_p5 = scmp.eq.s32.totalorder %s2921_s25, 1 }
  0x36   : > { %3334 = sst [smem:[#allocation17_spill]] %s2996_s13  ;;  %s3311_s15 = sand.u32 1, %s2848_s23  }
  0x37   : > { %p3000_p7 = por %p3335_p5, %p40_p2  ;;  %s3006_s16 = sshll.u32 %s2852_s24, 7 }
  0x38   : > { %s3010_s17 = sshll.u32 %s3311_s15, 3  ;;  %p3012_p9 = pnand %p2589_p10, %p42_p3 }
  0x39   : > { %s3336_s14 = scalar_select %p3000_p7, 1, 0 }
  0x3a   : > { %s3337_s7 = scalar_select %p3012_p9, 1, 0 }
  0x3b   : > { %s258_s10 = sand.u32 1, %s2852_s24   ;;  %s3338_s1 = sld [smem:[#allocation18_spill]] }
  0x3c   : > { %s262_s30 = scalar_lea.vmem [#allocation5], %s3010_s17  ;;  %s3026_s15 = scalar_lea.sflag [#allocation6], %s258_s10 }
  0x3d   : > { %s269_s12 = sshll.u32 %s262_s30, 4  ;;  %p3032_p0 = pneg %p3012_p9  ;;  %s3024_s12 = int_to_ptr.vmem [resolvable:$true] %s269_s12 }
  0x3f   : > { %s3339_s26 = scalar_select %p3032_p0, 1, 0 }
  0x41   : > { %s3021_s19 = scalar_lea.hbm %s3338_s1, %s3006_s16  ;;  %s2665_s3 = scalar_lea.hbm %s3338_s1, 256 }
  0x42   : > { %s2660_s20 = scalar_lea.hbm %s3021_s19, 128  ;;  %p2666_p6 = scmp.lt.u32.totalorder %s3021_s19, %s3338_s1 }
  0x43   : > { %p2661_p12 = scmp.ne.s32.totalorder %s3021_s19, %s2660_s20  ;;  %p2667_p10 = scmp.lt.u32.totalorder %s2665_s3, %s2660_s20 }
  0x44   : > { %p2669_p5 = scmp.lt.u32.totalorder %s2660_s20, %s3021_s19 }
  0x45   : > { %p2663_p1 = pnand %p3032_p0, %p2661_p12  ;;  %p2668_p3 = por %p2667_p10, %p2666_p6 }
  0x47   : > { %p2664_p2 = pneg %p2663_p1  ;;  %p2670_p13 = por %p2669_p5, %p2668_p3 }
  0x49   : > { %p2671_p7 = pnand %p2670_p13, %p2664_p2 }
  0x4b   : > { %2674 = shalt.err (!%p2671_p7)
}
  0x4c   : > { %s2675_s10 = scalar_lea.vmem %s3024_s12, 128  ;;  %s2857_s11 = smov [#allocation5]  }
  0x4d   : > { %p2676_p12 = scmp.ne.s32.totalorder %s3024_s12, %s2675_s10  ;;  %s2680_s18 = sshll.u32 %s2857_s11, 4  ;;  %s2681_s18 = int_to_ptr.vmem [resolvable:$false] %s2680_s18 }
  0x4e   : > { %s2682_s13 = scalar_lea.vmem %s2681_s18, 256  ;;  %p2683_p8 = scmp.lt.s32.totalorder %s3024_s12, %s2681_s18 }
  0x4f   : > { %p2678_p1 = pnand %p2676_p12, %p3032_p0  ;;  %p2684_p11 = scmp.lt.s32.totalorder %s2682_s13, %s2675_s10 }
  0x51   : > { %p2679_p4 = pneg %p2678_p1  ;;  %p2685_p6 = por %p2684_p11, %p2683_p8 }
  0x53   : > { %p2686_p10 = pnand %p2685_p6, %p2679_p4 }
  0x55   : > { %2689 = shalt.err (!%p2686_p10)
}
  0x56   : > { %2579 = dma.hbm_to_vmem [thread:$0]  (!%p3012_p9), %s3021_s19, 128, %s3024_s12, %s3026_s15  }
  0x57   : > { %s2858_s3 = smov [#allocation10]   ;;  %s2690_s11 = scalar_lea.hbm %s3308_s5, 512 }
  0x58   : > { %s226_s20 = sshll.u32 %s2858_s3, 4  ;;  %p2691_p8 = scmp.ne.s32.totalorder %s3308_s5, %s2690_s11  ;;  %s227_s20 = int_to_ptr.vmem [resolvable:$true] %s226_s20 }
  0x59   : > { %p3340_p4 = scmp.ne.s32.totalorder %s3331_s8, 0  ;;  %p2697_p2 = scmp.lt.u32.totalorder %s2690_s11, %s3308_s5 }
  0x5b   : > { %p3341_p11 = pneg %p3340_p4 }
  0x5d   : > { %p2693_p13 = pnand %p2691_p8, %p3341_p11 }
  0x5f   : > { %p2694_p7 = pneg %p2693_p13 }
  0x61   : > { %p2699_p3 = pnand %p2697_p2, %p2694_p7 }
  0x63   : > { %2702 = shalt.err (!%p2699_p3)
}
  0x64   : > { %s2703_s19 = scalar_lea.vmem %s227_s20, 512  ;;  %p3342_p12 = pmov %p3341_p11 }
  0x65   : > { %p2704_p5 = scmp.ne.s32.totalorder %s227_s20, %s2703_s19  ;;  %p2711_p10 = scmp.lt.s32.totalorder %s227_s20, %s227_s20 }
  0x66   : > { %p2712_p9 = scmp.lt.s32.totalorder %s2703_s19, %s2703_s19 }
  0x67   : > { %p2706_p1 = pnand %p2704_p5, %p3342_p12 }
  0x68   : > { %p2713_p0 = por %p2712_p9, %p2711_p10 }
  0x69   : > { %p2707_p6 = pneg %p2706_p1 }
  0x6b   : > { %p2714_p8 = pnand %p2713_p0, %p2707_p6 }
  0x6d   : > { %2717 = shalt.err (!%p2714_p8)
}
  0x6e   : > { %s3343_s1 = smov 8   ;;  %s3344_s9 = smov 128  }
  0x6f   : > { %2572 = dma.hbm_to_vmem [thread:$0]  (!%p3340_p4), %s3308_s5, 512, %s227_s20, [#allocation9], %s3344_s9, %s3344_s9, %s3343_s1  }
  0x70   : > { %s3083_s18 = scalar_lea.hbm %s3303_s0, %s3006_s16  ;;  %s244_s8 = scalar_lea.vmem [#allocation2], %s3010_s17 }
  0x71   : > { %s251_s10 = sshll.u32 %s244_s8, 4  ;;  %s3345_s13 = sand.u32 1, %s2848_s23   ;;  %s252_s10 = int_to_ptr.vmem [resolvable:$true] %s251_s10 }
  0x72   : > { %s241_s19 = scalar_lea.sflag [#allocation3], %s3345_s13  ;;  %s2718_s12 = scalar_lea.hbm %s3083_s18, 128 }
  0x73   : > { %p2719_p9 = scmp.ne.s32.totalorder %s3083_s18, %s2718_s12  ;;  %p3346_p0 = scmp.ne.s32.totalorder %s3339_s26, 0 }
  0x74   : > { %s2723_s9 = scalar_lea.hbm %s3303_s0, 256  ;;  %p2724_p4 = scmp.lt.u32.totalorder %s3083_s18, %s3303_s0 }
  0x75   : > { %p2721_p11 = pnand %p2719_p9, %p3346_p0  ;;  %p2725_p7 = scmp.lt.u32.totalorder %s2723_s9, %s2718_s12 }
  0x76   : > { %p2727_p3 = scmp.lt.u32.totalorder %s2718_s12, %s3083_s18 }
  0x77   : > { %p2722_p13 = pneg %p2721_p11  ;;  %p2726_p2 = por %p2725_p7, %p2724_p4 }
  0x79   : > { %p2728_p5 = por %p2727_p3, %p2726_p2 }
  0x7b   : > { %p2729_p12 = pnand %p2728_p5, %p2722_p13 }
  0x7d   : > { %2732 = shalt.err (!%p2729_p12)
}
  0x7e   : > { %s2733_s11 = scalar_lea.vmem %s252_s10, 128  ;;  %s2859_s8 = smov [#allocation2]  }
  0x7f   : > { %p2734_p1 = scmp.ne.s32.totalorder %s252_s10, %s2733_s11  ;;  %s2738_s13 = sshll.u32 %s2859_s8, 4  ;;  %s2739_s13 = int_to_ptr.vmem [resolvable:$false] %s2738_s13 }
  0x80   : > { %s2740_s20 = scalar_lea.vmem %s2739_s13, 256  ;;  %p2741_p8 = scmp.lt.s32.totalorder %s252_s10, %s2739_s13 }
  0x81   : > { %p2736_p6 = pnand %p2734_p1, %p3346_p0  ;;  %p2742_p9 = scmp.lt.s32.totalorder %s2740_s20, %s2733_s11 }
  0x83   : > { %p2737_p10 = pneg %p2736_p6  ;;  %p2743_p11 = por %p2742_p9, %p2741_p8 }
  0x85   : > { %p2744_p4 = pnand %p2743_p11, %p2737_p10 }
  0x87   : > { %2747 = shalt.err (!%p2744_p4)
}
  0x88   : > { %p3347_p7 = scmp.ne.s32.totalorder %s3337_s7, 0  ;;  %s3109_s9 = scalar_lea.hbm %s3305_s2, %s3006_s16 }
  0x89   : > { %s280_s3 = scalar_lea.vmem [#allocation7], %s3010_s17  ;;  %s2748_s11 = scalar_lea.hbm %s3109_s9, 128 }
  0x8a   : > { %2576 = dma.hbm_to_vmem [thread:$0]  (!%p3347_p7), %s3083_s18, 128, %s252_s10, %s241_s19  }
  0x8b   : > { %s287_s30 = sshll.u32 %s280_s3, 4  ;;  %p2749_p13 = scmp.ne.s32.totalorder %s3109_s9, %s2748_s11  ;;  %s288_s30 = int_to_ptr.vmem [resolvable:$true] %s287_s30 }
  0x8c   : > { %s2753_s18 = scalar_lea.hbm %s3305_s2, 256  ;;  %p2754_p5 = scmp.lt.u32.totalorder %s3109_s9, %s3305_s2 }
  0x8d   : > { %p2751_p2 = pnand %p2749_p13, %p3346_p0  ;;  %p2755_p12 = scmp.lt.u32.totalorder %s2753_s18, %s2748_s11 }
  0x8e   : > { %p2757_p6 = scmp.lt.u32.totalorder %s2748_s11, %s3109_s9 }
  0x8f   : > { %p2752_p3 = pneg %p2751_p2  ;;  %p2756_p1 = por %p2755_p12, %p2754_p5 }
  0x91   : > { %p2758_p10 = por %p2757_p6, %p2756_p1 }
  0x93   : > { %p2759_p8 = pnand %p2758_p10, %p2752_p3 }
  0x95   : > { %2762 = shalt.err (!%p2759_p8)
}
  0x96   : > { %s2763_s16 = scalar_lea.vmem %s288_s30, 128  ;;  %s2860_s17 = smov [#allocation7]  }
  0x97   : > { %p2764_p9 = scmp.ne.s32.totalorder %s288_s30, %s2763_s16  ;;  %s2768_s20 = sshll.u32 %s2860_s17, 4  ;;  %s2769_s20 = int_to_ptr.vmem [resolvable:$false] %s2768_s20 }
  0x98   : > { %s2770_s12 = scalar_lea.vmem %s2769_s20, 256  ;;  %p2771_p13 = scmp.lt.s32.totalorder %s288_s30, %s2769_s20 }
  0x99   : > { %p2766_p11 = pnand %p2764_p9, %p3346_p0  ;;  %p2772_p2 = scmp.lt.s32.totalorder %s2770_s12, %s2763_s16 }
  0x9b   : > { %p2767_p4 = pneg %p2766_p11  ;;  %p2773_p7 = por %p2772_p2, %p2771_p13 }
  0x9d   : > { %p2774_p5 = pnand %p2773_p7, %p2767_p4 }
  0x9f   : > { %2777 = shalt.err (!%p2774_p5)
}
  0xa0   : > { %p3348_p12 = scmp.ne.s32.totalorder %s3337_s7, 0  ;;  %p3349_p3 = scmp.ne.s32.totalorder %s3330_s29, 0 }
  0xa1   : > { %s3133_s26 = sand.u32 (!%p3349_p3), 1, %s2844_s22   ;;  %p3350_p0 = scmp.ne.s32.totalorder (!%p3349_p3), %s3328_s27, 0 }
  0xa2   : > { %2582 = dma.hbm_to_vmem [thread:$0]  (!%p3348_p12), %s3109_s9, 128, %s288_s30, %s3026_s15  }
  0xa3   : > { %296 = sbr.rel (%p3349_p3) target bundleno = 1117 (0x45d), region = 44  ;;  %s3136_s1 = sshll.u32 (!%p3349_p3), %s3133_s26, 3 }
  0xa4   : > { %s299_s3 = scalar_lea.sflag (!%p3349_p3), [#allocation3], %s3133_s26  ;;  %s302_s11 = scalar_lea.vmem (!%p3349_p3), [#allocation2], %s3136_s1 }
  0xaa   : > { %2823 = dma.done.wait (%p3350_p0), %s299_s3, 128  }
  0xab   : > { %2825 = vsyncadd (%p3350_p0), %s299_s3, 4294967168  ;;  %s307_s29 = sand.u32 1, %s2921_s25   ;;  %s311_s7 = scalar_lea.vmem [#allocation5], %s3136_s1 }
  0xac   : > { %s308_s15 = scalar_lea.sflag [#allocation6], %s307_s29 }
  0xad   : > { %2827 = dma.done.wait (%p3350_p0), %s308_s15, 256  }
  0xae   : > { %2829 = vsyncadd (%p3350_p0), %s308_s15, 4294967040  ;;  %s320_s9 = scalar_lea.vmem [#allocation7], %s3136_s1  ;;  %p3351_p7 = scmp.eq.s32.totalorder %s2921_s25, 0 }
  0xb0   : > { %2831 = dma.done.wait (%p3351_p7), [#allocation9], 1024   ;;  %p3352_p1 = pmov %p3351_p7 }
  0xb1   : > { %v368_v0 = vld [vmem:[%s311_s7] sm:$0xff]  ;;  %v369_v1 = vld [vmem:[%s320_s9] sm:$0xff]  ;;  %vm406_vm0 = vcmask 64512   ;;  %v2861_v35 = vmov 0.0|0.0   ;;  %vm2862_vm1 = vmmov 0   ;;  %v2863_v36 = vmov 0.0  }
  0xb2   : > { %2833 = vsyncadd (%p3352_p1), [#allocation9], 4294966272  ;;  %374 = vxpose.xlu0.b32.start.end [1/1] (short) (narrow) %v368_v0, 32  ;;  %v3155_v2 = vand.u32 4294901760, %v369_v1  ;;  %2438 = vmatprep.subr.bf16.mxu1 %v2861_v35  ;;  %vm1002_vm2 = vcmask 261120   ;;  %v370_v37 = vld [vmem:[#allocation8] sm:$0xff] }
  0xb3   : > { %2314 = vmatprep.mubr.msk.f32.mxu1 %vm2862_vm1, %v2863_v36  ;;  %v371_v38 = vld [vmem:[#allocation8 + $0x8] sm:$0xff]  ;;  %v1502_v39 = vsel %vm1002_vm2, %v370_v37, 0  ;;  %v367_v46 = vld [vmem:[%s302_s11] sm:$0xff]  ;;  %v994_v50 = vld [vmem:[#allocation10] sm:$0xff]  ;;  %s2165_s8 = sshll.u32 %s2921_s25, 7  ;;  %s366_s13 = scalar_lea.vmem [#allocation11], %s3136_s1 }
  0xb4   : > { %2258 = vmatprep.subr.mxu0 %v3155_v2  ;;  %v527_v3 = vsub.f32 %v369_v1, %v3155_v2  ;;  %v1505_v40 = vsel %vm1002_vm2, %v371_v38, 0  ;;  %v1514_v41 = vand.u32 4294901760, %v1502_v39  ;;  %v1004_v47 = vsel %vm1002_vm2, %v367_v46, 0  ;;  %v995_v49 = vld [vmem:[#allocation10 + $0x8] sm:$0xff]  ;;  %v997_v56 = vld [vmem:[#allocation10 + $0x18] sm:$0xff]  ;;  %v996_v58 = vld [vmem:[#allocation10 + $0x10] sm:$0xff]  ;;  %s3258_s16 = scalar_lea.hbm %s3309_s6, %s2165_s8 }
  0xb5   : > { %2259 = vmatpush3.msra.mxu0 %v3155_v2  ;;  %v1517_v42 = vand.u32 4294901760, %v1505_v40  ;;  %v3187_v48 = vand.u32 4294901760, %v1004_v47  ;;  %s2013_s18 = sshll.u32 %s366_s13, 4  ;;  %s2000_s17 = scalar_lea.sflag [#allocation4], %s3133_s26  ;;  %s3260_s18 = int_to_ptr.vmem [resolvable:$true] %s2013_s18 }
  0xb6   : > { %v528_v4 = vand.u32 4294901760, %v527_v3  ;;  %v3178_v44 = vsub.f32 %v1502_v39, %v1514_v41  ;;  %s2778_s20 = scalar_lea.vmem %s3260_s18, 128  ;;  %p3353_p10 = scmp.ne.s32.totalorder %s3336_s14, 0 }
  0xb7   : > { %v3176_v43 = vpack.c.bf16 %v1517_v42, %v1514_v41  ;;  %v3180_v45 = vsub.f32 %v1505_v40, %v1517_v42  ;;  %v3190_v51 = vsub.f32 %v1004_v47, %v3187_v48  ;;  %p2779_p6 = scmp.ne.s32.totalorder %s3260_s18, %s2778_s20  ;;  %s2864_s25 = smov [#allocation11]  }
  0xb8   : > { %v529_v5 = vsub.f32 %v527_v3, %v528_v4  ;;  %v1595_v38 = vand.u32 4294901760, %v3178_v44  ;;  %s2782_s12 = sshll.u32 %s2864_s25, 4  ;;  %s2783_s12 = int_to_ptr.vmem [resolvable:$false] %s2782_s12 }
  0xb9   : > { %v1077_v59 = vand.u32 4294901760, %v3190_v51  ;;  %v1602_v39 = vand.u32 4294901760, %v3180_v45  ;;  %p2780_p8 = pnand %p2779_p6, %p3353_p10  ;;  %s2784_s1 = scalar_lea.vmem %s2783_s12, 256 }
  0xba   : > { %v530_v6 = vand.u32 4294901760, %v529_v5  ;;  %v1596_v41 = vsub.f32 %v3178_v44, %v1595_v38  ;;  %p2785_p11 = scmp.lt.s32.totalorder %s3260_s18, %s2783_s12  ;;  %p2786_p4 = scmp.lt.s32.totalorder %s2784_s1, %s2778_s20 }
  0xbb   : > { %v2499_v40 = vpack.c.bf16 %v1602_v39, %v1595_v38  ;;  %v1603_v42 = vsub.f32 %v3180_v45, %v1602_v39  ;;  %p2781_p9 = pneg %p2780_p8 }
  0xbc   : > { %2266 = vmatprep.subr.mxu0 %v530_v6  ;;  %v1597_v46 = vand.u32 4294901760, %v1596_v41  ;;  %p2787_p13 = por %p2786_p4, %p2785_p11 }
  0xbd   : > { %v1604_v47 = vand.u32 4294901760, %v1603_v42 }
  0xbe   : > { %p2788_p2 = pnand %p2787_p13, %p2781_p9 }
 0x132   : > { %v390_v7 = vpop.trf.xlu0 }
 0x133   : > { %v408_v8 = vsel %vm406_vm0, %v390_v7, 0 }
 0x134   : > { %v485_v9 = vand.u32 4294901760, %v408_v8 }
 0x136   : > { %v486_v10 = vsub.f32 %v408_v8, %v485_v9  ;;  %v391_v11 = vpop.trf.xlu0 }
 0x137   : > { %v411_v12 = vsel %vm406_vm0, %v391_v11, 0 }
 0x138   : > { %v495_v13 = vand.u32 4294901760, %v411_v12  ;;  %v487_v14 = vand.u32 4294901760, %v486_v10 }
 0x13a   : > { %v496_v15 = vsub.f32 %v411_v12, %v495_v13  ;;  %v392_v16 = vpop.trf.xlu0  ;;  %v488_v17 = vsub.f32 %v486_v10, %v487_v14 }
 0x13b   : > { %v414_v18 = vsel %vm406_vm0, %v392_v16, 0 }
 0x13c   : > { %v497_v19 = vand.u32 4294901760, %v496_v15  ;;  %v505_v20 = vand.u32 4294901760, %v414_v18  ;;  %v489_v21 = vand.u32 4294901760, %v488_v17 }
 0x13e   : > { %v506_v22 = vsub.f32 %v414_v18, %v505_v20  ;;  %2260 = vmatprep.mubr.f32.mxu0 %v489_v21  ;;  %v393_v23 = vpop.trf.xlu0  ;;  %v498_v24 = vsub.f32 %v496_v15, %v497_v19 }
 0x13f   : > { %v417_v25 = vsel %vm406_vm0, %v393_v23, 0 }
 0x140   : > { %v507_v26 = vand.u32 4294901760, %v506_v22  ;;  %v515_v27 = vand.u32 4294901760, %v417_v25  ;;  %v499_v28 = vand.u32 4294901760, %v498_v24 }
 0x142   : > { %v516_v29 = vsub.f32 %v417_v25, %v515_v27  ;;  %2261 = vmatmul.mubr.f32.vlgmr.msra.gmra.mrb[0].mxu0 %v499_v28  ;;  %v508_v30 = vsub.f32 %v506_v22, %v507_v26 }
 0x143   : > { %2267 = vmatpush3.msra.mxu0 %v530_v6  ;;  %v1078_v6 = vsub.f32 %v3190_v51, %v1077_v59 }
 0x144   : > { %v517_v31 = vand.u32 4294901760, %v516_v29  ;;  %v509_v32 = vand.u32 4294901760, %v508_v30  ;;  %2274 = vmatprep.subr.mxu0 %v527_v3  ;;  %v373_v30 = vld [vmem:[#allocation8 + $0x18] sm:$0xff] }
 0x145   : > { %v1079_v18 = vand.u32 4294901760, %v1078_v6 }
 0x146   : > { %2263 = vmatprep.mubr.f32.mxu0 %v509_v32  ;;  %v518_v33 = vsub.f32 %v516_v29, %v517_v31  ;;  %v1511_v32 = vsel %vm1002_vm2, %v373_v30, 0 }
 0x148   : > { %v519_v34 = vand.u32 4294901760, %v518_v33 }
 0x14a   : > { %2264 = vmatmul.mubr.f32.gmra.mrb[2].mxu0 %v519_v34  ;;  %v1523_v34 = vand.u32 4294901760, %v1511_v32 }
 0x14b   : > { %2268 = vmatprep.mubr.f32.mxu0 %v485_v9 }
 0x14e   : > { %2269 = vmatmul.mubr.f32.vlgmr.msra.gmra.mrb[0].mxu0 %v495_v13 }
 0x14f   : > { %2271 = vmatprep.mubr.f32.mxu0 %v505_v20  ;;  %2275 = vmatpush3.msra.mxu0 %v527_v3 }
 0x150   : > { %2282 = vmatprep.subr.mxu0 %v3155_v2 }
 0x152   : > { %2272 = vmatmul.mubr.f32.gmra.mrb[2].mxu0 %v515_v27 }
 0x153   : > { %2276 = vmatprep.mubr.f32.mxu0 %v486_v10 }
 0x156   : > { %2277 = vmatmul.mubr.f32.vlgmr.msra.gmra.mrb[0].mxu0 %v496_v15 }
 0x157   : > { %2279 = vmatprep.mubr.f32.mxu0 %v506_v22  ;;  %2283 = vmatpush3.msra.mxu0 %v3155_v2 }
 0x158   : > { %2290 = vmatprep.subr.mxu0 %v528_v4 }
 0x15a   : > { %2280 = vmatmul.mubr.f32.gmra.mrb[2].mxu0 %v516_v29  ;;  %v372_v29 = vld [vmem:[#allocation8 + $0x10] sm:$0xff] }
 0x15b   : > { %2284 = vmatprep.mubr.f32.mxu0 %v487_v14 }
 0x15e   : > { %2285 = vmatmul.mubr.f32.vlgmr.msra.gmra.mrb[0].mxu0 %v497_v19 }
 0x15f   : > { %2287 = vmatprep.mubr.f32.mxu0 %v507_v26  ;;  %2291 = vmatpush3.msra.mxu0 %v528_v4 }
 0x160   : > { %2298 = vmatprep.subr.mxu0 %v3155_v2 }
 0x162   : > { %2288 = vmatmul.mubr.f32.gmra.mrb[2].mxu0 %v517_v31  ;;  %v1508_v31 = vsel %vm1002_vm2, %v372_v29, 0 }
 0x163   : > { %2292 = vmatprep.mubr.f32.mxu0 %v485_v9  ;;  %v1520_v33 = vand.u32 4294901760, %v1508_v31 }
 0x165   : > { %v2478_v37 = vpack.c.bf16 %v1523_v34, %v1520_v33 }
 0x166   : > { %2293 = vmatmul.mubr.f32.vlgmr.msra.gmra.mrb[0].mxu0 %v495_v13 }
 0x167   : > { %2295 = vmatprep.mubr.f32.mxu0 %v505_v20  ;;  %2299 = vmatpush3.msra.mxu0 %v3155_v2 }
 0x168   : > { %2492 = vmatprep.subr.bf16.mxu0 %v2861_v35 }
 0x16a   : > { %2296 = vmatmul.mubr.f32.gmra.mrb[2].mxu0 %v515_v27 }
 0x16b   : > { %2300 = vmatprep.mubr.f32.mxu0 %v485_v9 }
 0x16e   : > { %2301 = vmatmul.mubr.f32.vlgmr.msra.gmra.mrb[0].mxu0 %v495_v13 }
 0x16f   : > { %2303 = vmatprep.mubr.f32.mxu0 %v505_v20  ;;  %2494 = vmatpush3.bf16.xpose.msra.mxu0 %v3176_v43 }
 0x170   : > { %2495 = vmatprep.subr.bf16.mxu0 %v2861_v35 }
 0x172   : > { %2304 = vmatmul.mubr.f32.gmra.mrb[2].mxu0 %v515_v27 }
 0x173   : > { %2413 = vmatprep.mubr.msk.f32.mxu0 %vm2862_vm1, %v2863_v36 }
 0x177   : > { %2497 = vmatpush3.bf16.xpose.msra.mxu0 %v2478_v37 }
 0x178   : > { %2498 = vmatprep.subr.bf16.mxu0 %v2861_v35 }
 0x241   : > { %v2302_v52 = vpop.f32.mrb[0].mxu0 }
 0x242   : > { %v999_v53 = vmul.f32 %v2302_v52, %v995_v49  ;;  %v972_v54 = vpop.f32.mrb[1].mxu0  ;;  %v1615_v49 = vsub.f32 %v1511_v32, %v1523_v34 }
 0x243   : > { %v998_v55 = vmul.f32 %v994_v50, %v972_v54  ;;  %v2481_v50 = vpack.c.bf16 %v1604_v47, %v1597_v46 }
 0x244   : > { %v1010_v57 = vand.u32 4294901760, %v999_v53  ;;  %v1616_v52 = vand.u32 4294901760, %v1615_v49 }
 0x245   : > { %v1007_v60 = vand.u32 4294901760, %v998_v55  ;;  %v2305_v61 = vpop.f32.mrb[2].mxu0 }
 0x246   : > { %v1094_v62 = vsub.f32 %v999_v53, %v1010_v57  ;;  %v1001_v63 = vmul.f32 %v2305_v61, %v997_v56  ;;  %v984_v0 = vpop.f32.mrb[3].mxu0 }
 0x247   : > { %v1087_v1 = vsub.f32 %v998_v55, %v1007_v60  ;;  %v1000_v2 = vmul.f32 %v996_v58, %v984_v0  ;;  %v2439_v3 = vpack.c.bf16 %v1010_v57, %v1007_v60  ;;  %v1617_v55 = vsub.f32 %v1615_v49, %v1616_v52 }
 0x248   : > { %v1095_v4 = vand.u32 4294901760, %v1094_v62  ;;  %v1016_v5 = vand.u32 4294901760, %v1001_v63 }
 0x249   : > { %v1088_v7 = vand.u32 4294901760, %v1087_v1  ;;  %v2451_v8 = vpack.c.bf16 %v1094_v62, %v1087_v1  ;;  %v1013_v9 = vand.u32 4294901760, %v1000_v2  ;;  %2440 = vmatpush3.bf16.msra.mxu1 %v2439_v3  ;;  %v1618_v57 = vand.u32 4294901760, %v1617_v55 }
 0x24a   : > { %v1096_v10 = vsub.f32 %v1094_v62, %v1095_v4  ;;  %v1108_v11 = vsub.f32 %v1001_v63, %v1016_v5  ;;  %2441 = vmatprep.subr.bf16.mxu1 %v2861_v35 }
 0x24b   : > { %v1089_v12 = vsub.f32 %v1087_v1, %v1088_v7  ;;  %v1101_v13 = vsub.f32 %v1000_v2, %v1013_v9  ;;  %v2442_v14 = vpack.c.bf16 %v1016_v5, %v1013_v9  ;;  %v2463_v15 = vpack.c.bf16 %v1095_v4, %v1088_v7 }
 0x24c   : > { %v1097_v16 = vand.u32 4294901760, %v1096_v10  ;;  %v1109_v17 = vand.u32 4294901760, %v1108_v11 }
 0x24d   : > { %v1090_v19 = vand.u32 4294901760, %v1089_v12  ;;  %v1102_v20 = vand.u32 4294901760, %v1101_v13  ;;  %v2454_v21 = vpack.c.bf16 %v1108_v11, %v1101_v13  ;;  %2443 = vmatpush3.bf16.msra.mxu1 %v2442_v14 }
 0x24e   : > { %v1110_v22 = vsub.f32 %v1108_v11, %v1109_v17  ;;  %2444 = vmatprep.subr.bf16.mxu1 %v2861_v35 }
 0x24f   : > { %v1103_v23 = vsub.f32 %v1101_v13, %v1102_v20  ;;  %v2445_v24 = vpack.c.bf16 %v1097_v16, %v1090_v19  ;;  %v2466_v25 = vpack.c.bf16 %v1109_v17, %v1102_v20 }
 0x250   : > { %v1111_v26 = vand.u32 4294901760, %v1110_v22  ;;  %2315 = vmatmul.mubr.f32.vlgmr.msra.gmra.mrb[0].mxu1 %v1079_v18 }
 0x251   : > { %v1104_v27 = vand.u32 4294901760, %v1103_v23  ;;  %2446 = vmatpush3.bf16.msra.mxu1 %v2445_v24  ;;  %2325 = vmatprep.mubr.msk.f32.mxu1 %vm2862_vm1, %v2863_v36 }
 0x252   : > { %2447 = vmatprep.subr.bf16.mxu1 %v2861_v35 }
 0x253   : > { %v2448_v28 = vpack.c.bf16 %v1111_v26, %v1104_v27 }
 0x255   : > { %2449 = vmatpush3.bf16.msra.mxu1 %v2448_v28 }
 0x256   : > { %2450 = vmatprep.subr.bf16.mxu1 %v2861_v35 }
 0x258   : > { %2326 = vmatmul.mubr.f32.vlgmr.msra.gmra.mrb[0].mxu1 %v3187_v48 }
 0x259   : > { %2452 = vmatpush3.bf16.msra.mxu1 %v2451_v8  ;;  %2336 = vmatprep.mubr.msk.f32.mxu1 %vm2862_vm1, %v2863_v36 }
 0x25a   : > { %2453 = vmatprep.subr.bf16.mxu1 %v2861_v35 }
 0x25d   : > { %2455 = vmatpush3.bf16.msra.mxu1 %v2454_v21 }
 0x25e   : > { %2456 = vmatprep.subr.bf16.mxu1 %v2861_v35 }
 0x260   : > { %2337 = vmatmul.mubr.f32.vlgmr.msra.gmra.mrb[0].mxu1 %v3190_v51 }
 0x261   : > { %2458 = vmatpush3.bf16.msra.mxu1 %v2439_v3  ;;  %2347 = vmatprep.mubr.msk.f32.mxu1 %vm2862_vm1, %v2863_v36 }
 0x262   : > { %2459 = vmatprep.subr.bf16.mxu1 %v2861_v35 }
 0x265   : > { %2461 = vmatpush3.bf16.msra.mxu1 %v2442_v14 }
 0x266   : > { %2462 = vmatprep.subr.bf16.mxu1 %v2861_v35 }
 0x268   : > { %2348 = vmatmul.mubr.f32.vlgmr.msra.gmra.mrb[0].mxu1 %v1077_v59  ;;  %v2487_v59 = vpack.c.bf16 %v3180_v45, %v3178_v44  ;;  %v2163_v45 = vld [vmem:[%s3307_s4] ss:$0 sm:$0xff] }
 0x269   : > { %2464 = vmatpush3.bf16.msra.mxu1 %v2463_v15  ;;  %2358 = vmatprep.mubr.msk.f32.mxu1 %vm2862_vm1, %v2863_v36 }
 0x26a   : > { %2465 = vmatprep.subr.bf16.mxu1 %v2861_v35 }
 0x26d   : > { %2467 = vmatpush3.bf16.msra.mxu1 %v2466_v25 }
 0x26e   : > { %2468 = vmatprep.subr.bf16.mxu1 %v2861_v35 }
 0x270   : > { %2359 = vmatmul.mubr.f32.vlgmr.msra.gmra.mrb[0].mxu1 %v3187_v48 }
 0x271   : > { %2470 = vmatpush3.bf16.msra.mxu1 %v2439_v3  ;;  %2369 = vmatprep.mubr.msk.f32.mxu1 %vm2862_vm1, %v2863_v36 }
 0x272   : > { %2471 = vmatprep.subr.bf16.mxu1 %v2861_v35 }
 0x275   : > { %2473 = vmatpush3.bf16.msra.mxu1 %v2442_v14 }
 0x276   : > { %2474 = vmatprep.subr.bf16.mxu1 %v2861_v35 }
 0x278   : > { %2370 = vmatmul.mubr.f32.vlgmr.msra.gmra.mrb[0].mxu1 %v3187_v48  ;;  %v1608_v48 = vsub.f32 %v1508_v31, %v1520_v33 }
 0x279   : > { %2380 = vmatprep.mubr.msk.f32.mxu1 %vm2862_vm1, %v2863_v36 }
 0x27a   : > { %v1609_v51 = vand.u32 4294901760, %v1608_v48  ;;  %v2490_v60 = vpack.c.bf16 %v1615_v49, %v1608_v48 }
 0x27c   : > { %v2502_v53 = vpack.c.bf16 %v1616_v52, %v1609_v51  ;;  %v1610_v54 = vsub.f32 %v1608_v48, %v1609_v51 }
 0x27e   : > { %2476 = vmatpush3.bf16.xpose.msra.mxu1 %v3176_v43  ;;  %v1611_v56 = vand.u32 4294901760, %v1610_v54 }
 0x27f   : > { %2477 = vmatprep.subr.bf16.mxu1 %v2861_v35 }
 0x280   : > { %v2484_v58 = vpack.c.bf16 %v1618_v57, %v1611_v56 }
 0x286   : > { %2479 = vmatpush3.bf16.xpose.msra.mxu1 %v2478_v37 }
 0x287   : > { %2480 = vmatprep.subr.bf16.mxu1 %v2861_v35 }
 0x34b   : > { %v1487_v61 = vpop.f32.mrb[0].mxu1 }
 0x34c   : > { %v1499_v62 = vsel %vm1002_vm2, %v1487_v61, 0  ;;  %v2371_v63 = vpop.f32.mrb[1].mxu1 }
 0x34d   : > { %v1582_v0 = vand.u32 4294901760, %v1499_v62 }
 0x34f   : > { %v1583_v1 = vsub.f32 %v1499_v62, %v1582_v0 }
 0x351   : > { %v1584_v2 = vand.u32 4294901760, %v1583_v1 }
 0x353   : > { %v1585_v3 = vsub.f32 %v1583_v1, %v1584_v2  ;;  %2414 = vmatmul.mubr.f32.vlgmr.msra.gmra.mrb[4].mxu0 %v1584_v2 }
 0x354   : > { %2500 = vmatpush3.bf16.xpose.msra.mxu0 %v2499_v40  ;;  %2424 = vmatprep.mubr.msk.f32.mxu0 %vm2862_vm1, %v2863_v36 }
 0x355   : > { %v1586_v4 = vand.u32 4294901760, %v1585_v3  ;;  %2501 = vmatprep.subr.bf16.mxu0 %v2861_v35 }
 0x357   : > { %2381 = vmatmul.mubr.f32.vlgmr.msra.gmra.mrb[2].mxu1 %v1586_v4 }
 0x358   : > { %2482 = vmatpush3.bf16.xpose.msra.mxu1 %v2481_v50  ;;  %2391 = vmatprep.mubr.msk.f32.mxu1 %vm2862_vm1, %v2863_v36 }
 0x359   : > { %2483 = vmatprep.subr.bf16.mxu1 %v2861_v35 }
 0x35c   : > { %2503 = vmatpush3.bf16.xpose.msra.mxu0 %v2502_v53 }
 0x35d   : > { %2504 = vmatprep.subr.bf16.mxu0 %v2861_v35 }
 0x360   : > { %2485 = vmatpush3.bf16.xpose.msra.mxu1 %v2484_v58 }
 0x361   : > { %2486 = vmatprep.subr.bf16.mxu1 %v2861_v35 }
 0x363   : > { %2425 = vmatmul.mubr.f32.vlgmr.msra.gmra.mrb[4].mxu0 %v1582_v0 }
 0x364   : > { %2506 = vmatpush3.bf16.xpose.msra.mxu0 %v3176_v43  ;;  %2435 = vmatprep.mubr.msk.f32.mxu0 %vm2862_vm1, %v2863_v36 }
 0x365   : > { %2507 = vmatprep.subr.bf16.mxu0 %v2861_v35 }
 0x367   : > { %2392 = vmatmul.mubr.f32.vlgmr.msra.gmra.mrb[2].mxu1 %v1582_v0 }
 0x368   : > { %2488 = vmatpush3.bf16.xpose.msra.mxu1 %v2487_v59  ;;  %2402 = vmatprep.mubr.msk.f32.mxu1 %vm2862_vm1, %v2863_v36 }
 0x369   : > { %2489 = vmatprep.subr.bf16.mxu1 %v2861_v35 }
 0x36c   : > { %2509 = vmatpush3.bf16.xpose.msra.mxu0 %v2478_v37 }
 0x370   : > { %2491 = vmatpush3.bf16.xpose.msra.mxu1 %v2490_v60 }
 0x373   : > { %2436 = vmatmul.mubr.f32.vlgmr.msra.gmra.mrb[4].mxu0 %v1582_v0 }
 0x377   : > { %2403 = vmatmul.mubr.f32.vlgmr.msra.gmra.mrb[2].mxu1 %v1583_v1 }
 0x446   : > { %v1994_v44 = vpop.f32.mrb[4].mxu0 }
 0x447   : > { %v2437_v43 = vpop.f32.mrb[5].mxu0 }
 0x44a   : > { %v1759_v5 = vpop.f32.mrb[2].mxu1 }
 0x44b   : > { %v2510_v6 = vadd.f32 %v2163_v45, %v1759_v5  ;;  %v2404_v36 = vpop.f32.mrb[3].mxu1 }
 0x44d   : > { %v2511_v7 = vadd.f32 %v2510_v6, %v1994_v44 }
 0x44f   : > { %1998 = vst.msk [vmem:[%s366_s13] sm:$0xff] %vm1002_vm2, %v2511_v7 }
 0x450   : > { %2791 = shalt.err (!%p2788_p2)
}
 0x451   : > { %s2792_s26 = scalar_lea.hbm %s3258_s16, 128  ;;  %s2796_s29 = scalar_lea.hbm %s3309_s6, 256 }
 0x452   : > { %p2793_p5 = scmp.ne.s32.totalorder %s3258_s16, %s2792_s26  ;;  %p2797_p0 = scmp.lt.u32.totalorder %s3258_s16, %s3309_s6 }
 0x453   : > { %p2798_p7 = scmp.lt.u32.totalorder %s2796_s29, %s2792_s26  ;;  %p2800_p6 = scmp.lt.u32.totalorder %s2792_s26, %s3258_s16 }
 0x454   : > { %p2794_p12 = pnand %p2793_p5, %p3353_p10 }
 0x455   : > { %p2799_p1 = por %p2798_p7, %p2797_p0 }
 0x456   : > { %p2795_p3 = pneg %p2794_p12 }
 0x457   : > { %p2801_p8 = por %p2800_p6, %p2799_p1 }
 0x459   : > { %p2802_p9 = pnand %p2801_p8, %p2795_p3 }
 0x45b   : > { %2805 = shalt.err (!%p2802_p9)
}
 0x45c   : > { %2564 = dma.vmem_to_hbm [thread:$0]  (%p3353_p10), %s3260_s18, 128, %s3258_s16, %s2000_s17  }
 0x45d PF: > { %s2025_s9 = sand.u32 1, %s2840_s21   ;;  %p3354_p11 = scmp.ne.s32.totalorder %s3329_s28, 0 }
 0x45e   : > { %p3355_p4 = scmp.ge.s32.totalorder %s2852_s24, 2  ;;  %s2026_s27 = scalar_lea.sflag [#allocation4], %s2025_s9 }
 0x460   : > { %p2584_p13 = pnand %p3355_p4, %p3354_p11 }
 0x462   : > { %2835 = dma.done.wait (!%p2584_p13), %s2026_s27, 128  }
 0x463   : > { %2837 = vsyncadd (!%p2584_p13), %s2026_s27, 4294967168  ;;  %s3356_s24 = sld [smem:[#allocation16_spill]]  ;;  %s3357_s30 = sld [smem:[#allocation17_spill]] }
 0x464   : > { %s3358_s21 = smov %s2844_s22  ;;  %s3359_s22 = smov %s2848_s23 }
 0x469   : > { %p23_p2 = scmp.ge.s32.totalorder %s3356_s24, 4   ;;  %s3360_s23 = smov %s3357_s30 }
 0x46b   :  { %25 = sbr.rel (!%p23_p2) target bundleno = 11 (0xb), region = 121 }
 0x472   :  { %2031 = vsyncpa [#allocation3], 1 }
 0x473   :  { %2033 = vsyncpa [#allocation3 + $0x1], 1 }
 0x474   :  { %2034 = vsyncpa [#allocation6], 1 }
 0x475   :  { %2036 = vsyncpa [#allocation6 + $0x1], 1 }
 0x476   :  { %2037 = vsyncpa [#allocation9], 1 }
 0x477   :  { %2038 = vsyncpa [#allocation4], 1 }
 0x478   :  { %2040 = vsyncpa [#allocation4 + $0x1], 1 }

</bundles_post_ra>
